<compile_context>
chip_gen: v6e
topology: v6e:2x2x1
jax: 0.10.0
libtpu: 0.0.40
codegen_flags: <defaults>
</compile_context>

<pallas_src>
import math
import numpy as np
import jax
import jax.numpy as jnp
from jax import lax
from jax.experimental import pallas as pl
from jax.experimental.pallas import tpu as pltpu

NEG_INF = -1e30

# Set to jnp.bfloat16 on v6e/v7x for ~2x MXU throughput and half the operand bytes;
# kept float32 here for exact numerical parity with the float32 PyTorch reference.
MATMUL_DTYPE = jnp.float32


# ----------------------------- fused kernel -----------------------------------


def llama_block_kernel(x_ref, scale_ref, wqkv_ref, wo_ref, bo_ref,
                       w1_ref, b1_ref, wgl_ref, bgl_ref,
                       cos_ref, sin_e_ref, sin_o_ref, beta_ref, o_ref):
    """Whole LlamaBlock for one batch element, fully resident in VMEM."""
    x = x_ref[0]                               # (m, d)
    m, d = x.shape
    Hd = wo_ref.shape[0]                       # n_heads * d_model
    H = Hd // d
    cd = MATMUL_DTYPE

    def mm(a, b):                              # a @ b, f32 accumulation
        return jnp.dot(a.astype(cd), b.astype(cd),
                       preferred_element_type=jnp.float32)

    def mm_t(a, b):                            # a @ b.T (contract last dims)
        return lax.dot_general(a.astype(cd), b.astype(cd),
                               (((1,), (1,)), ((), ())),
                               preferred_element_type=jnp.float32)

    scale = scale_ref[...]                     # (m, d)
    inv_sqrt_n = 1.0 / math.sqrt(m * d)

    def rms(v):
        # Frobenius norm over the whole (seq, d) block — matches the reference RMSNorm.
        ff = jnp.sqrt(jnp.sum(v * v)) * inv_sqrt_n
        return scale * (v / ff)

    # ---- x = rms(x) ----
    xn1 = rms(x)

    # ---- fused Q/K/V projection for all heads: (m, d) @ (d, 3*H*d) ----
    qkv = mm(xn1, wqkv_ref[...])               # (m, 3*Hd): [q heads | k heads | v heads]

    # ---- RoPE on the concatenated [Q | K] slab via XLU lane rolls ----
    #   out[2i]   =  cos * t[2i]   + sin * t[2i+1]
    #   out[2i+1] =  cos * t[2i+1] - sin * t[2i]
    # roll(t, W-1)[j] = t[j+1], roll(t, 1)[j] = t[j-1]; the wrapped lanes and the
    # head / q-k boundary lanes are multiplied by zero sin coefficients, so the
    # single W-wide rotate is exact for every head.
    W = 2 * Hd
    qk = qkv[:, :W]                            # (m, 2*Hd)
    qk_rot = (cos_ref[...] * qk
              + sin_e_ref[...] * pltpu.roll(qk, W - 1, axis=1)
              + sin_o_ref[...] * pltpu.roll(qk, 1, axis=1))
    v_all = qkv[:, W:]                         # (m, Hd)

    # ---- per-head causal softmax attention, output projection folded in ----
    row = lax.broadcasted_iota(jnp.int32, (m, m), 0)
    col = lax.broadcasted_iota(jnp.int32, (m, m), 1)
    causal = col <= row
    sm_scale = 1.0 / math.sqrt(d)
    wo = wo_ref[...]                           # (Hd, d)

    attn = jnp.zeros((m, d), jnp.float32)
    for h in range(H):                         # static unroll (H known at trace time)
        qh = qk_rot[:, h * d:(h + 1) * d]
        kh = qk_rot[:, Hd + h * d:Hd + (h + 1) * d]
        vh = v_all[:, h * d:(h + 1) * d]
        s = mm_t(qh, kh) * sm_scale
        s = jnp.where(causal, s, NEG_INF)
        s = s - jnp.max(s, axis=-1, keepdims=True)
        p = jnp.exp(s)
        p = p * pl.reciprocal(jnp.sum(p, axis=-1, keepdims=True), approx=True)
        oh = mm(p, vh)                         # (m, d)
        # concat(heads) @ Wo  ==  sum_h  head_h @ Wo[h*d:(h+1)*d, :]
        attn = attn + mm(oh, wo[h * d:(h + 1) * d, :])

    # x = x + attention(x)   (attention dropout / nn.Dropout are identity in eval)
    x2 = xn1 + attn + bo_ref[...]

    # ---- x = rms(x) ----
    xn2 = rms(x2)

    # ---- x = x + feedforward(x):  Linear -> SwiGLU ----
    ff = mm(xn2, w1_ref[...]) + b1_ref[...]            # (m, d)
    gl = mm(ff, wgl_ref[...]) + bgl_ref[...]           # (m, 2d): [gate | lin] fused
    g = gl[:, :d]
    lin = gl[:, d:]
    beta = beta_ref[0]                                 # scalar from SMEM
    swish = g * jax.nn.sigmoid(beta * g)
    o_ref[0] = (xn2 + swish * lin).astype(o_ref.dtype)


# ----------------------------- wrapper -----------------------------------------


def llama_block(x, params):
    b, m, d = x.shape
    wqkv = params["wqkv"]
    Hd = wqkv.shape[1] // 3
    H = Hd // d

    # Slice the position tables to the live sequence length and tile them over the
    # [q heads | k heads] slab (tiny one-off XLA ops outside the kernel).
    cos = jnp.tile(params["rope_cos"][:m], (1, 2 * H))         # (m, 2*Hd)
    sin_e = jnp.tile(params["rope_sin_even"][:m], (1, 2 * H))  # (m, 2*Hd)
    sin_o = jnp.tile(params["rope_sin_odd"][:m], (1, 2 * H))   # (m, 2*Hd)
    scale = params["rms_scale"][:m]                            # (m, d)

    # Fuse the SwiGLU gate / linear projections into one wide matmul operand.
    wgl = jnp.concatenate([params["wg"], params["wl"]], axis=1)   # (d, 2d)
    bgl = jnp.concatenate([params["bg"], params["bl"]], axis=1)   # (1, 2d)

    def const2d(shape):
        return pl.BlockSpec(shape, lambda i: (0, 0))

    return pl.pallas_call(
        llama_block_kernel,
        out_shape=jax.ShapeDtypeStruct((b, m, d), x.dtype),
        grid=(b,),
        in_specs=[
            pl.BlockSpec((1, m, d), lambda i: (i, 0, 0)),       # x
            const2d((m, d)),                                    # rms scale
            const2d((d, 3 * Hd)),                               # fused W_qkv
            const2d((Hd, d)),                                   # W_o
            const2d((1, d)),                                    # b_o
            const2d((d, d)),                                    # W_1 (feedforward linear)
            const2d((1, d)),                                    # b_1
            const2d((d, 2 * d)),                                # fused [W_gate | W_lin]
            const2d((1, 2 * d)),                                # fused [b_gate | b_lin]
            const2d((m, 2 * Hd)),                               # cos table
            const2d((m, 2 * Hd)),                               # +sin on even lanes
            const2d((m, 2 * Hd)),                               # -sin on odd lanes
            pl.BlockSpec(memory_space=pltpu.MemorySpace.SMEM),  # beta scalar
        ],
        out_specs=pl.BlockSpec((1, m, d), lambda i: (i, 0, 0)),
        compiler_params=pltpu.CompilerParams(
            dimension_semantics=("parallel",)),
    )(x, scale, wqkv, params["wo"], params["bo"],
      params["w1"], params["b1"], wgl, bgl,
      cos, sin_e, sin_o, params["beta"])


# ----------------------------- param / table construction ----------------------


def make_rope_tables(context_window, d):
    """cos / signed-sin tables for the roll-based RoPE rotation.

    The reference rotary matrix gives, per position:
        out[2i]   =  cos*q[2i]   + sin*q[2i+1]
        out[2i+1] =  cos*q[2i+1] - sin*q[2i]
    sin_even holds +sin on even lanes (multiplies roll-by-(-1)),
    sin_odd holds  -sin on odd lanes  (multiplies roll-by-(+1)).
    """
    cos_t = np.zeros((context_window, d), np.float32)
    sin_e = np.zeros((context_window, d), np.float32)
    sin_o = np.zeros((context_window, d), np.float32)
    for pos in range(context_window):
        for i in range(d // 2):
            theta = 10000.0 ** (-2.0 * (i - 1) / d)   # (i-1) matches the reference
            mt = pos * theta
            c, s = np.cos(mt), np.sin(mt)
            cos_t[pos, 2 * i] = c
            cos_t[pos, 2 * i + 1] = c
            sin_e[pos, 2 * i] = s
            sin_o[pos, 2 * i + 1] = -s
    return jnp.asarray(cos_t), jnp.asarray(sin_e), jnp.asarray(sin_o)


def make_params(key, context_window, d, n_heads):
    ks = jax.random.split(key, 7)

    def init(k, shape, scale=0.05):
        return jax.random.normal(k, shape, jnp.float32) * scale

    cos_t, sin_e, sin_o = make_rope_tables(context_window, d)
    Hd = n_heads * d
    return {
        "rms_scale": jnp.ones((context_window, d), jnp.float32),
        # fused projection weights, columns = [q heads | k heads | v heads]
        "wqkv": init(ks[0], (d, 3 * Hd)),
        "wo": init(ks[1], (Hd, d)),
        "bo": init(ks[2], (1, d)),
        "w1": init(ks[3], (d, d)),
        "b1": init(ks[4], (1, d)),
        "wg": init(ks[5], (d, d)),
        "bg": jnp.zeros((1, d), jnp.float32),
        "wl": init(ks[6], (d, d)),
        "bl": jnp.zeros((1, d), jnp.float32),
        "beta": jnp.ones((1,), jnp.float32),
        "rope_cos": cos_t,
        "rope_sin_even": sin_e,
        "rope_sin_odd": sin_o,
    }


# ----------------------------- main ---------------------------------------------


if __name__ == "__main__":
    config = dict(d_model=32, context_window=16, n_heads=2)
    batch, seq = 2, 8

    key = jax.random.PRNGKey(0)
    k_x, k_p = jax.random.split(key)
    x = jax.random.normal(k_x, (batch, seq, config["d_model"]), jnp.float32)
    params = make_params(k_p, config["context_window"], config["d_model"],
                         config["n_heads"])

    out = jax.jit(llama_block)(x, params)
    out = jax.block_until_ready(out)
    assert out.shape == (batch, seq, config["d_model"])
    assert bool(jnp.all(jnp.isfinite(out)))
    print("KERNEL_OK")
</pallas_src>

<mosaic_0001>
module attributes {stable_mosaic.version = 11 : i64} {
  func.func @llama_block_kernel(%arg0: i32, %arg1: memref<1x8x32xf32, #tpu.memory_space<vmem>>, %arg2: memref<8x32xf32, #tpu.memory_space<vmem>>, %arg3: memref<32x192xf32, #tpu.memory_space<vmem>>, %arg4: memref<64x32xf32, #tpu.memory_space<vmem>>, %arg5: memref<1x32xf32, #tpu.memory_space<vmem>>, %arg6: memref<32x32xf32, #tpu.memory_space<vmem>>, %arg7: memref<1x32xf32, #tpu.memory_space<vmem>>, %arg8: memref<32x64xf32, #tpu.memory_space<vmem>>, %arg9: memref<1x64xf32, #tpu.memory_space<vmem>>, %arg10: memref<8x128xf32, #tpu.memory_space<vmem>>, %arg11: memref<8x128xf32, #tpu.memory_space<vmem>>, %arg12: memref<8x128xf32, #tpu.memory_space<vmem>>, %arg13: memref<1xf32, #tpu.memory_space<smem>>, %arg14: memref<1x8x32xf32, #tpu.memory_space<vmem>>) attributes {dimension_semantics = [#tpu.dimension_semantics<parallel>], iteration_bounds = array<i64: 2>, scalar_prefetch = 0 : i64, scratch_operands = 0 : i64, tpu.core_type = #tpu.core_type<tc>, window_params = [{transform_indices = @transform_0, window_bounds = array<i64: 1, 8, 32>}, {pipeline_mode = #tpu.pipeline_mode<synchronous>, transform_indices = @transform_1, window_bounds = array<i64: 8, 32>}, {pipeline_mode = #tpu.pipeline_mode<synchronous>, transform_indices = @transform_2, window_bounds = array<i64: 32, 192>}, {pipeline_mode = #tpu.pipeline_mode<synchronous>, transform_indices = @transform_3, window_bounds = array<i64: 64, 32>}, {pipeline_mode = #tpu.pipeline_mode<synchronous>, transform_indices = @transform_4, window_bounds = array<i64: 1, 32>}, {pipeline_mode = #tpu.pipeline_mode<synchronous>, transform_indices = @transform_5, window_bounds = array<i64: 32, 32>}, {pipeline_mode = #tpu.pipeline_mode<synchronous>, transform_indices = @transform_6, window_bounds = array<i64: 1, 32>}, {pipeline_mode = #tpu.pipeline_mode<synchronous>, transform_indices = @transform_7, window_bounds = array<i64: 32, 64>}, {pipeline_mode = #tpu.pipeline_mode<synchronous>, transform_indices = @transform_8, window_bounds = array<i64: 1, 64>}, {pipeline_mode = #tpu.pipeline_mode<synchronous>, transform_indices = @transform_9, window_bounds = array<i64: 8, 128>}, {pipeline_mode = #tpu.pipeline_mode<synchronous>, transform_indices = @transform_10, window_bounds = array<i64: 8, 128>}, {pipeline_mode = #tpu.pipeline_mode<synchronous>, transform_indices = @transform_11, window_bounds = array<i64: 8, 128>}, {transform_indices = @transform_12, window_bounds = array<i64: 1>}, {transform_indices = @transform_13, window_bounds = array<i64: 1, 8, 32>}]} {
    %c0 = arith.constant 0 : index
    %c0_0 = arith.constant 0 : index
    %c0_1 = arith.constant 0 : index
    %0 = vector.load %arg1[%c0, %c0_0, %c0_1] : memref<1x8x32xf32, #tpu.memory_space<vmem>>, vector<1x8x32xf32>
    %1 = vector.shape_cast %0 : vector<1x8x32xf32> to vector<8x32xf32>
    %c0_2 = arith.constant 0 : index
    %c0_3 = arith.constant 0 : index
    %2 = vector.load %arg2[%c0_2, %c0_3] : memref<8x32xf32, #tpu.memory_space<vmem>>, vector<8x32xf32>
    %3 = arith.mulf %1, %1 : vector<8x32xf32>
    %4 = vector.shape_cast %3 : vector<8x32xf32> to vector<1x8x32xf32>
    %cst = arith.constant dense<0.000000e+00> : vector<1xf32>
    %5 = vector.multi_reduction <add>, %4, %cst [1, 2] : vector<1x8x32xf32> to vector<1xf32>
    %6 = vector.shape_cast %5 : vector<1xf32> to vector<1x1x1xf32>
    %7 = vector.extract %6[0, 0, 0] : f32 from vector<1x1x1xf32>
    %8 = math.sqrt %7 : f32
    %cst_4 = arith.constant 6.250000e-02 : f32
    %9 = arith.mulf %8, %cst_4 : f32
    %10 = vector.broadcast %9 : f32 to vector<8x32xf32>
    %11 = arith.divf %1, %10 : vector<8x32xf32>
    %12 = arith.mulf %2, %11 : vector<8x32xf32>
    %c0_5 = arith.constant 0 : index
    %c0_6 = arith.constant 0 : index
    %13 = vector.load %arg3[%c0_5, %c0_6] : memref<32x192xf32, #tpu.memory_space<vmem>>, vector<32x192xf32>
    %cst_7 = arith.constant dense<0.000000e+00> : vector<8x192xf32>
    %14 = tpu.matmul %12, %13, %cst_7 {dimension_numbers = #tpu.dot_dimension_numbers<[1], [0], [0], [1], [0, 0, 1, 1], [], []>} : vector<8x32xf32>, vector<32x192xf32>, vector<8x192xf32> -> vector<8x192xf32>
    %15 = vector.extract_strided_slice %14 {offsets = [0, 0], sizes = [8, 128], strides = [1, 1]} : vector<8x192xf32> to vector<8x128xf32>
    %c0_8 = arith.constant 0 : index
    %c0_9 = arith.constant 0 : index
    %16 = vector.load %arg10[%c0_8, %c0_9] : memref<8x128xf32, #tpu.memory_space<vmem>>, vector<8x128xf32>
    %17 = arith.mulf %16, %15 : vector<8x128xf32>
    %c0_10 = arith.constant 0 : index
    %c0_11 = arith.constant 0 : index
    %18 = vector.load %arg11[%c0_10, %c0_11] : memref<8x128xf32, #tpu.memory_space<vmem>>, vector<8x128xf32>
    %c127_i32 = arith.constant 127 : i32
    %19 = tpu.dynamic_rotate %15 by %c127_i32 dim 1 : vector<8x128xf32>, i32 -> vector<8x128xf32>
    %20 = arith.mulf %18, %19 : vector<8x128xf32>
    %21 = arith.addf %17, %20 : vector<8x128xf32>
    %c0_12 = arith.constant 0 : index
    %c0_13 = arith.constant 0 : index
    %22 = vector.load %arg12[%c0_12, %c0_13] : memref<8x128xf32, #tpu.memory_space<vmem>>, vector<8x128xf32>
    %c1_i32 = arith.constant 1 : i32
    %23 = tpu.dynamic_rotate %15 by %c1_i32 dim 1 : vector<8x128xf32>, i32 -> vector<8x128xf32>
    %24 = arith.mulf %22, %23 : vector<8x128xf32>
    %25 = arith.addf %21, %24 : vector<8x128xf32>
    %26 = vector.extract_strided_slice %14 {offsets = [0, 128], sizes = [8, 64], strides = [1, 1]} : vector<8x192xf32> to vector<8x64xf32>
    %27 = tpu.iota {dimensions = array<i32: 0>} : vector<8x8xi32>
    %28 = tpu.iota {dimensions = array<i32: 1>} : vector<8x8xi32>
    %29 = arith.cmpi sle, %28, %27 : vector<8x8xi32>
    %c0_14 = arith.constant 0 : index
    %c0_15 = arith.constant 0 : index
    %30 = vector.load %arg4[%c0_14, %c0_15] : memref<64x32xf32, #tpu.memory_space<vmem>>, vector<64x32xf32>
    %cst_16 = arith.constant 0.000000e+00 : f32
    %31 = vector.broadcast %cst_16 : f32 to vector<8x32xf32>
    %32 = vector.extract_strided_slice %25 {offsets = [0, 0], sizes = [8, 32], strides = [1, 1]} : vector<8x128xf32> to vector<8x32xf32>
    %33 = vector.extract_strided_slice %25 {offsets = [0, 64], sizes = [8, 32], strides = [1, 1]} : vector<8x128xf32> to vector<8x32xf32>
    %34 = vector.extract_strided_slice %26 {offsets = [0, 0], sizes = [8, 32], strides = [1, 1]} : vector<8x64xf32> to vector<8x32xf32>
    %cst_17 = arith.constant dense<0.000000e+00> : vector<8x8xf32>
    %35 = tpu.matmul %32, %33, %cst_17 {dimension_numbers = #tpu.dot_dimension_numbers<[1], [1], [0], [0], [0, 0, 1, 0], [], []>} : vector<8x32xf32>, vector<8x32xf32>, vector<8x8xf32> -> vector<8x8xf32>
    %cst_18 = arith.constant 0.176776692 : f32
    %36 = vector.broadcast %cst_18 : f32 to vector<8x8xf32>
    %37 = arith.mulf %35, %36 : vector<8x8xf32>
    %cst_19 = arith.constant -1.000000e+30 : f32
    %38 = vector.broadcast %cst_19 : f32 to vector<8x8xf32>
    %39 = arith.select %29, %37, %38 : vector<8x8xi1>, vector<8x8xf32>
    %cst_20 = arith.constant dense<0xFF800000> : vector<8xf32>
    %40 = vector.multi_reduction <maximumf>, %39, %cst_20 [1] : vector<8x8xf32> to vector<8xf32>
    %41 = vector.shape_cast %40 : vector<8xf32> to vector<8x1xf32>
    %42 = vector.broadcast %41 : vector<8x1xf32> to vector<8x8xf32>
    %43 = arith.subf %39, %42 : vector<8x8xf32>
    %44 = math.exp %43 : vector<8x8xf32>
    %cst_21 = arith.constant dense<0.000000e+00> : vector<8xf32>
    %45 = vector.multi_reduction <add>, %44, %cst_21 [1] : vector<8x8xf32> to vector<8xf32>
    %46 = vector.shape_cast %45 : vector<8xf32> to vector<8x1xf32>
    %47 = tpu.reciprocal %46 {approx = true} : vector<8x1xf32> -> vector<8x1xf32>
    %48 = vector.broadcast %47 : vector<8x1xf32> to vector<8x8xf32>
    %49 = arith.mulf %44, %48 : vector<8x8xf32>
    %cst_22 = arith.constant dense<0.000000e+00> : vector<8x32xf32>
    %50 = tpu.matmul %49, %34, %cst_22 {dimension_numbers = #tpu.dot_dimension_numbers<[1], [0], [0], [1], [0, 0, 1, 1], [], []>} : vector<8x8xf32>, vector<8x32xf32>, vector<8x32xf32> -> vector<8x32xf32>
    %51 = vector.extract_strided_slice %30 {offsets = [0, 0], sizes = [32, 32], strides = [1, 1]} : vector<64x32xf32> to vector<32x32xf32>
    %cst_23 = arith.constant dense<0.000000e+00> : vector<8x32xf32>
    %52 = tpu.matmul %50, %51, %cst_23 {dimension_numbers = #tpu.dot_dimension_numbers<[1], [0], [0], [1], [0, 0, 1, 1], [], []>} : vector<8x32xf32>, vector<32x32xf32>, vector<8x32xf32> -> vector<8x32xf32>
    %53 = arith.addf %31, %52 : vector<8x32xf32>
    %54 = vector.extract_strided_slice %25 {offsets = [0, 32], sizes = [8, 32], strides = [1, 1]} : vector<8x128xf32> to vector<8x32xf32>
    %55 = vector.extract_strided_slice %25 {offsets = [0, 96], sizes = [8, 32], strides = [1, 1]} : vector<8x128xf32> to vector<8x32xf32>
    %56 = vector.extract_strided_slice %26 {offsets = [0, 32], sizes = [8, 32], strides = [1, 1]} : vector<8x64xf32> to vector<8x32xf32>
    %cst_24 = arith.constant dense<0.000000e+00> : vector<8x8xf32>
    %57 = tpu.matmul %54, %55, %cst_24 {dimension_numbers = #tpu.dot_dimension_numbers<[1], [1], [0], [0], [0, 0, 1, 0], [], []>} : vector<8x32xf32>, vector<8x32xf32>, vector<8x8xf32> -> vector<8x8xf32>
    %cst_25 = arith.constant 0.176776692 : f32
    %58 = vector.broadcast %cst_25 : f32 to vector<8x8xf32>
    %59 = arith.mulf %57, %58 : vector<8x8xf32>
    %cst_26 = arith.constant -1.000000e+30 : f32
    %60 = vector.broadcast %cst_26 : f32 to vector<8x8xf32>
    %61 = arith.select %29, %59, %60 : vector<8x8xi1>, vector<8x8xf32>
    %cst_27 = arith.constant dense<0xFF800000> : vector<8xf32>
    %62 = vector.multi_reduction <maximumf>, %61, %cst_27 [1] : vector<8x8xf32> to vector<8xf32>
    %63 = vector.shape_cast %62 : vector<8xf32> to vector<8x1xf32>
    %64 = vector.broadcast %63 : vector<8x1xf32> to vector<8x8xf32>
    %65 = arith.subf %61, %64 : vector<8x8xf32>
    %66 = math.exp %65 : vector<8x8xf32>
    %cst_28 = arith.constant dense<0.000000e+00> : vector<8xf32>
    %67 = vector.multi_reduction <add>, %66, %cst_28 [1] : vector<8x8xf32> to vector<8xf32>
    %68 = vector.shape_cast %67 : vector<8xf32> to vector<8x1xf32>
    %69 = tpu.reciprocal %68 {approx = true} : vector<8x1xf32> -> vector<8x1xf32>
    %70 = vector.broadcast %69 : vector<8x1xf32> to vector<8x8xf32>
    %71 = arith.mulf %66, %70 : vector<8x8xf32>
    %cst_29 = arith.constant dense<0.000000e+00> : vector<8x32xf32>
    %72 = tpu.matmul %71, %56, %cst_29 {dimension_numbers = #tpu.dot_dimension_numbers<[1], [0], [0], [1], [0, 0, 1, 1], [], []>} : vector<8x8xf32>, vector<8x32xf32>, vector<8x32xf32> -> vector<8x32xf32>
    %73 = vector.extract_strided_slice %30 {offsets = [32, 0], sizes = [32, 32], strides = [1, 1]} : vector<64x32xf32> to vector<32x32xf32>
    %cst_30 = arith.constant dense<0.000000e+00> : vector<8x32xf32>
    %74 = tpu.matmul %72, %73, %cst_30 {dimension_numbers = #tpu.dot_dimension_numbers<[1], [0], [0], [1], [0, 0, 1, 1], [], []>} : vector<8x32xf32>, vector<32x32xf32>, vector<8x32xf32> -> vector<8x32xf32>
    %75 = arith.addf %53, %74 : vector<8x32xf32>
    %76 = arith.addf %12, %75 : vector<8x32xf32>
    %c0_31 = arith.constant 0 : index
    %c0_32 = arith.constant 0 : index
    %77 = vector.load %arg5[%c0_31, %c0_32] : memref<1x32xf32, #tpu.memory_space<vmem>>, vector<1x32xf32>
    %78 = vector.broadcast %77 : vector<1x32xf32> to vector<8x32xf32>
    %79 = arith.addf %76, %78 : vector<8x32xf32>
    %80 = arith.mulf %79, %79 : vector<8x32xf32>
    %81 = vector.shape_cast %80 : vector<8x32xf32> to vector<1x8x32xf32>
    %cst_33 = arith.constant dense<0.000000e+00> : vector<1xf32>
    %82 = vector.multi_reduction <add>, %81, %cst_33 [1, 2] : vector<1x8x32xf32> to vector<1xf32>
    %83 = vector.shape_cast %82 : vector<1xf32> to vector<1x1x1xf32>
    %84 = vector.extract %83[0, 0, 0] : f32 from vector<1x1x1xf32>
    %85 = math.sqrt %84 : f32
    %cst_34 = arith.constant 6.250000e-02 : f32
    %86 = arith.mulf %85, %cst_34 : f32
    %87 = vector.broadcast %86 : f32 to vector<8x32xf32>
    %88 = arith.divf %79, %87 : vector<8x32xf32>
    %89 = arith.mulf %2, %88 : vector<8x32xf32>
    %c0_35 = arith.constant 0 : index
    %c0_36 = arith.constant 0 : index
    %90 = vector.load %arg6[%c0_35, %c0_36] : memref<32x32xf32, #tpu.memory_space<vmem>>, vector<32x32xf32>
    %cst_37 = arith.constant dense<0.000000e+00> : vector<8x32xf32>
    %91 = tpu.matmul %89, %90, %cst_37 {dimension_numbers = #tpu.dot_dimension_numbers<[1], [0], [0], [1], [0, 0, 1, 1], [], []>} : vector<8x32xf32>, vector<32x32xf32>, vector<8x32xf32> -> vector<8x32xf32>
    %c0_38 = arith.constant 0 : index
    %c0_39 = arith.constant 0 : index
    %92 = vector.load %arg7[%c0_38, %c0_39] : memref<1x32xf32, #tpu.memory_space<vmem>>, vector<1x32xf32>
    %93 = vector.broadcast %92 : vector<1x32xf32> to vector<8x32xf32>
    %94 = arith.addf %91, %93 : vector<8x32xf32>
    %c0_40 = arith.constant 0 : index
    %c0_41 = arith.constant 0 : index
    %95 = vector.load %arg8[%c0_40, %c0_41] : memref<32x64xf32, #tpu.memory_space<vmem>>, vector<32x64xf32>
    %cst_42 = arith.constant dense<0.000000e+00> : vector<8x64xf32>
    %96 = tpu.matmul %94, %95, %cst_42 {dimension_numbers = #tpu.dot_dimension_numbers<[1], [0], [0], [1], [0, 0, 1, 1], [], []>} : vector<8x32xf32>, vector<32x64xf32>, vector<8x64xf32> -> vector<8x64xf32>
    %c0_43 = arith.constant 0 : index
    %c0_44 = arith.constant 0 : index
    %97 = vector.load %arg9[%c0_43, %c0_44] : memref<1x64xf32, #tpu.memory_space<vmem>>, vector<1x64xf32>
    %98 = vector.broadcast %97 : vector<1x64xf32> to vector<8x64xf32>
    %99 = arith.addf %96, %98 : vector<8x64xf32>
    %100 = vector.extract_strided_slice %99 {offsets = [0, 0], sizes = [8, 32], strides = [1, 1]} : vector<8x64xf32> to vector<8x32xf32>
    %101 = vector.extract_strided_slice %99 {offsets = [0, 32], sizes = [8, 32], strides = [1, 1]} : vector<8x64xf32> to vector<8x32xf32>
    %c0_45 = arith.constant 0 : index
    %102 = memref.load %arg13[%c0_45] : memref<1xf32, #tpu.memory_space<smem>>
    %103 = vector.broadcast %102 : f32 to vector<8x32xf32>
    %104 = arith.mulf %103, %100 : vector<8x32xf32>
    %105 = arith.negf %104 : vector<8x32xf32>
    %106 = math.exp %105 : vector<8x32xf32>
    %cst_46 = arith.constant 1.000000e+00 : f32
    %107 = vector.broadcast %cst_46 : f32 to vector<8x32xf32>
    %108 = arith.addf %107, %106 : vector<8x32xf32>
    %109 = arith.divf %107, %108 : vector<8x32xf32>
    %110 = arith.mulf %100, %109 : vector<8x32xf32>
    %111 = arith.mulf %110, %101 : vector<8x32xf32>
    %112 = arith.addf %89, %111 : vector<8x32xf32>
    %c0_47 = arith.constant 0 : index
    %c0_48 = arith.constant 0 : index
    %c0_49 = arith.constant 0 : index
    %113 = vector.load %arg14[%c0_47, %c0_48, %c0_49] : memref<1x8x32xf32, #tpu.memory_space<vmem>>, vector<1x8x32xf32>
    %114 = vector.shape_cast %113 : vector<1x8x32xf32> to vector<8x32xf32>
    %115 = vector.shape_cast %112 : vector<8x32xf32> to vector<1x8x32xf32>
    tpu.vector_store %arg14[%c0_47, %c0_48, %c0_49], %115 {strides = array<i32>} : memref<1x8x32xf32, #tpu.memory_space<vmem>>, vector<1x8x32xf32>,
    return
  }
  func.func @transform_0(%arg0: i32) -> (i32, i32, i32) {
    %c0_i32 = arith.constant 0 : i32
    %c0_i32_0 = arith.constant 0 : i32
    %c0_i32_1 = arith.constant 0 : i32
    return %arg0, %c0_i32, %c0_i32_0 : i32, i32, i32
  }
  func.func @transform_1(%arg0: i32) -> (i32, i32) {
    %c0_i32 = arith.constant 0 : i32
    %c0_i32_0 = arith.constant 0 : i32
    %c0_i32_1 = arith.constant 0 : i32
    return %c0_i32, %c0_i32_0 : i32, i32
  }
  func.func @transform_2(%arg0: i32) -> (i32, i32) {
    %c0_i32 = arith.constant 0 : i32
    %c0_i32_0 = arith.constant 0 : i32
    %c0_i32_1 = arith.constant 0 : i32
    return %c0_i32, %c0_i32_0 : i32, i32
  }
  func.func @transform_3(%arg0: i32) -> (i32, i32) {
    %c0_i32 = arith.constant 0 : i32
    %c0_i32_0 = arith.constant 0 : i32
    %c0_i32_1 = arith.constant 0 : i32
    return %c0_i32, %c0_i32_0 : i32, i32
  }
  func.func @transform_4(%arg0: i32) -> (i32, i32) {
    %c0_i32 = arith.constant 0 : i32
    %c0_i32_0 = arith.constant 0 : i32
    %c0_i32_1 = arith.constant 0 : i32
    return %c0_i32, %c0_i32_0 : i32, i32
  }
  func.func @transform_5(%arg0: i32) -> (i32, i32) {
    %c0_i32 = arith.constant 0 : i32
    %c0_i32_0 = arith.constant 0 : i32
    %c0_i32_1 = arith.constant 0 : i32
    return %c0_i32, %c0_i32_0 : i32, i32
  }
  func.func @transform_6(%arg0: i32) -> (i32, i32) {
    %c0_i32 = arith.constant 0 : i32
    %c0_i32_0 = arith.constant 0 : i32
    %c0_i32_1 = arith.constant 0 : i32
    return %c0_i32, %c0_i32_0 : i32, i32
  }
  func.func @transform_7(%arg0: i32) -> (i32, i32) {
    %c0_i32 = arith.constant 0 : i32
    %c0_i32_0 = arith.constant 0 : i32
    %c0_i32_1 = arith.constant 0 : i32
    return %c0_i32, %c0_i32_0 : i32, i32
  }
  func.func @transform_8(%arg0: i32) -> (i32, i32) {
    %c0_i32 = arith.constant 0 : i32
    %c0_i32_0 = arith.constant 0 : i32
    %c0_i32_1 = arith.constant 0 : i32
    return %c0_i32, %c0_i32_0 : i32, i32
  }
  func.func @transform_9(%arg0: i32) -> (i32, i32) {
    %c0_i32 = arith.constant 0 : i32
    %c0_i32_0 = arith.constant 0 : i32
    %c0_i32_1 = arith.constant 0 : i32
    return %c0_i32, %c0_i32_0 : i32, i32
  }
  func.func @transform_10(%arg0: i32) -> (i32, i32) {
    %c0_i32 = arith.constant 0 : i32
    %c0_i32_0 = arith.constant 0 : i32
    %c0_i32_1 = arith.constant 0 : i32
    return %c0_i32, %c0_i32_0 : i32, i32
  }
  func.func @transform_11(%arg0: i32) -> (i32, i32) {
    %c0_i32 = arith.constant 0 : i32
    %c0_i32_0 = arith.constant 0 : i32
    %c0_i32_1 = arith.constant 0 : i32
    return %c0_i32, %c0_i32_0 : i32, i32
  }
  func.func @transform_12(%arg0: i32) -> i32 {
    %c0_i32 = arith.constant 0 : i32
    %c0_i32_0 = arith.constant 0 : i32
    return %c0_i32 : i32
  }
  func.func @transform_13(%arg0: i32) -> (i32, i32, i32) {
    %c0_i32 = arith.constant 0 : i32
    %c0_i32_0 = arith.constant 0 : i32
    %c0_i32_1 = arith.constant 0 : i32
    return %arg0, %c0_i32, %c0_i32_0 : i32, i32, i32
  }
}

</mosaic_0001>

<bundles_post_ra>
// kernel: tile.29
= control target key start
LH: loop header
LB: loop body
LE: loop exit
PB: predicated region body
PF: predicated region fallthrough
CT: control target
= control target key end

     0   :  { %vm43_vm0 = vcmask 1047556   ;;  %vm45_vm1 = vcmask 261120   ;;  %s94_s22 = smov 32   ;;  %s95_s25 = smov 64   ;;  %vm55_vm2 = vcmask 1048320   ;;  %vm65_vm3 = vcmask 785920   ;;  %s147_s0 = inlined_call_operand.vmem [shape: f32[8,4,32], index: 0, kind: input, shape index: {}]   ;;  %s148_s1 = inlined_call_operand.vmem [shape: f32[8,128], index: 1, kind: output, shape index: {}]  }
   0x1   :  { %v83_v0 = vld [vmem:[%s147_s0 + $0x1c] sm:$0xf]  ;;  %v84_v1 = vld [vmem:[%s147_s0 + $0x18] sm:$0xf]  ;;  %v85_v2 = vld [vmem:[%s147_s0 + $0x14] sm:$0xf] }
   0x2   :  { %9 = vst [vmem:[#allocation0 + $0x38] sm:$0xf] %v83_v0  ;;  %14 = vst [vmem:[#allocation0 + $0x30] sm:$0xf] %v84_v1  ;;  %v86_v3 = vld [vmem:[%s147_s0 + $0x10] sm:$0xf] }
   0x3   :  { %19 = vst [vmem:[#allocation0 + $0x28] sm:$0xf] %v85_v2  ;;  %v87_v4 = vld [vmem:[%s147_s0 + $0xc] sm:$0xf]  ;;  %v88_v5 = vld [vmem:[%s147_s0 + $0x8] sm:$0xf] }
   0x4   :  { %24 = vst [vmem:[#allocation0 + $0x20] sm:$0xf] %v86_v3  ;;  %29 = vst [vmem:[#allocation0 + $0x18] sm:$0xf] %v87_v4  ;;  %v89_v6 = vld [vmem:[%s147_s0 + $0x4] sm:$0xf] }
   0x5   :  { %34 = vst [vmem:[#allocation0 + $0x10] sm:$0xf] %v88_v5  ;;  %v39_v7 = vld [vmem:[%s147_s0] sm:$0xf]  ;;  %38 = vst [vmem:[#allocation0 + $0x8] sm:$0xf] %v89_v6 }
   0x6   :  { %40 = vst [vmem:[#allocation0] sm:$0xf] %v39_v7  ;;  %s93_s0 = smov 96   ;;  %vm75_vm4 = vcmask 523520  }
   0xb   :  { %v50_v8 = vld [vmem:[#allocation0 + $0x3] ss:$8 sm:$0xf0]   ;;  %v60_v9 = vld [vmem:[#allocation0 + $0x2] ss:$8 sm:$0xf0]  }
   0xc   :  { %v70_v14 = vld [vmem:[#allocation0 + $0x1] ss:$8 sm:$0xf0]   ;;  %v42_v17 = vld [vmem:[#allocation0] ss:$8 sm:$0xf0]  }
   0xd   :  { %v48_v10 = vld [vmem:[#allocation0 + $0x3] ss:$8 sm:$0xf]   ;;  %v58_v11 = vld [vmem:[#allocation0 + $0x2] ss:$8 sm:$0xf]  }
   0xe   :  { %v52_v12 = vsel %vm43_vm0, %v50_v8, %v48_v10  ;;  %v68_v13 = vld [vmem:[#allocation0 + $0x1] ss:$8 sm:$0xf]   ;;  %v41_v16 = vld [vmem:[#allocation0] ss:$8 sm:$0xf]   ;;  %v62_v18 = vsel %vm43_vm0, %v60_v9, %v58_v11 }
   0xf   :  { %53 = vrot.lane.b32.xlu0 %v52_v12, %s93_s0  ;;  %v72_v15 = vsel %vm43_vm0, %v70_v14, %v68_v13  ;;  %v44_v19 = vsel %vm43_vm0, %v42_v17, %v41_v16 }
  0x10   :  { %73 = vrot.lane.b32.xlu1 %v72_v15, %s94_s22  ;;  %46 = vst.msk [vmem:[%s148_s1] sm:$0xff] %vm45_vm1, %v44_v19  }
  0x13   :  { %63 = vrot.lane.b32.xlu0 %v62_v18, %s95_s25 }
  0x81   :  { %v54_v20 = vpop.permute.xlu0 %53  }
  0x82   :  { %56 = vst.msk [vmem:[%s148_s1] sm:$0xff] %vm55_vm2, %v54_v20   ;;  %v74_v21 = vpop.permute.xlu1 %73  }
  0x85   :  { %v64_v22 = vpop.permute.xlu0 %63  }
  0x86   :  { %66 = vst.msk [vmem:[%s148_s1] sm:$0xff] %vm65_vm3, %v64_v22  }
  0x87   :  { %76 = vst.msk [vmem:[%s148_s1] sm:$0xff] %vm75_vm4, %v74_v21  }

// kernel: llama_block.1
= control target key start
LH: loop header
LB: loop body
LE: loop exit
PB: predicated region body
PF: predicated region fallthrough
CT: control target
= control target key end

     0   :  { %s1922_s0 = inlined_call_operand.vmem [shape: f32[2,8,32], index: 0, kind: input, shape index: {}]   ;;  %s1923_s1 = inlined_call_operand.vmem [shape: f32[8,32], index: 1, kind: input, shape index: {}]   ;;  %s1924_s2 = inlined_call_operand.vmem [shape: f32[32,192], index: 2, kind: input, shape index: {}]   ;;  %s1925_s3 = inlined_call_operand.vmem [shape: f32[64,32], index: 3, kind: input, shape index: {}]   ;;  %s1926_s4 = inlined_call_operand.vmem [shape: f32[1,32], index: 4, kind: input, shape index: {}]   ;;  %s1927_s5 = inlined_call_operand.vmem [shape: f32[32,32], index: 5, kind: input, shape index: {}]   ;;  %s1928_s6 = inlined_call_operand.vmem [shape: f32[1,32], index: 6, kind: input, shape index: {}]   ;;  %s1929_s7 = inlined_call_operand.vmem [shape: f32[32,64], index: 7, kind: input, shape index: {}]   ;;  %s1930_s8 = inlined_call_operand.vmem [shape: f32[1,64], index: 8, kind: input, shape index: {}]   ;;  %s1931_s9 = inlined_call_operand.vmem [shape: f32[8,128], index: 9, kind: input, shape index: {}]   ;;  %s1932_s10 = inlined_call_operand.vmem [shape: f32[8,128], index: 10, kind: input, shape index: {}]   ;;  %s1933_s11 = inlined_call_operand.vmem [shape: f32[8,128], index: 11, kind: input, shape index: {}]   ;;  %s1934_s12 = inlined_call_operand.<no memory space> [shape: f32[1], index: 12, kind: input, shape index: {}]   ;;  %s1935_s13 = inlined_call_operand.hbm [shape: f32[2,8,32], index: 13, kind: output, shape index: {}]  }
   0x1   :  { %1936 = sst [smem:[#allocation6_spill]] %s1922_s0 }
   0x2   :  { %1937 = sst [smem:[#allocation7_spill]] %s1923_s1 }
   0x3   :  { %1938 = sst [smem:[#allocation8_spill]] %s1924_s2 }
   0x4   :  { %18 = sst [smem:[#allocation2]] %s1934_s12 }
   0x5   :  { %19 = vsyncpa [#allocation4], 0 }
   0x6   :  { %21 = vsyncpa [#allocation4 + $0x1], 0  ;;  %s1676_s27 = smov 0   ;;  %s1678_s28 = smov 0  }
   0x7   :  { %s1680_s29 = smov 0   ;;  %s1682_s30 = smov 0  }
   0x8 LB: > { %s1697_s12 = sadd.s32 4294967295, %s1593_s30   ;;  %s1342_s14 = sadd.s32 4294967294, %s1593_s30   ;;  %s1593_s30 = sphi %s1682_s30, %s1947_s30   ;;  %s1589_s29 = sphi %s1680_s29, %s1946_s29   ;;  %s1585_s28 = sphi %s1678_s28, %s1945_s28   ;;  %s1581_s27 = sphi %s1676_s27, %s1944_s27  }
   0x9   : > { %s1701_s15 = sadd.s32 1, %s1593_s30   ;;  %s312_s16 = sadd.s32 1, %s1589_s29 }
   0xa   : > { %s309_s17 = ssub.s32 %s1593_s30, %s1701_s15  ;;  %p322_p0 = scmp.ne.s32.totalorder %s1589_s29, %s1585_s28 }
   0xb   : > { %p310_p1 = scmp.eq.s32.totalorder %s309_s17, 0  ;;  %p323_p2 = scmp.eq.s32.totalorder %s1697_s12, 1 }
   0xc   : > { %p328_p3 = scmp.ne.s32.totalorder %s1585_s28, %s1581_s27  ;;  %p329_p4 = scmp.eq.s32.totalorder %s1342_s14, 1 }
   0xd   : > { %s1712_s18 = scalar_select %p310_p1, %s1589_s29, %s312_s16  }
   0xe   : > { %p1714_p5 = por %p323_p2, %p322_p0  ;;  %p1718_p6 = por %p329_p4, %p328_p3 }
   0xf   : > { %p1345_p7 = scmp.ge.s32.totalorder %s1593_s30, 1  ;;  %p390_p8 = scmp.lt.s32.totalorder %s1593_s30, 3 }
  0x11   : > { %p391_p9 = pnand %p1345_p7, %p390_p8 }
  0x12   : > { %p433_p10 = scmp.lt.s32.totalorder (!%p391_p9), %s1697_s12, 1  ;;  %s1941_s0 = sld [smem:[#allocation6_spill]] (!%p391_p9) }
  0x13   : > { %394 = sbr.rel (%p391_p9) target bundleno = 2474 (0x9aa), region = 72  ;;  %s1942_s2 = sld [smem:[#allocation8_spill]] (!%p391_p9) }
  0x14   : > { %s1943_s1 = sld [smem:[#allocation7_spill]] (!%p391_p9)  ;;  %s1596_s17 = smov (!%p391_p9), 1  }
  0x15   : > { %s1599_s16 = smov (!%p391_p9), 64   ;;  %s1252_s23 = sld [smem:[#allocation2]] (!%p391_p9) }
  0x18   : > { %s434_s21 = scalar_select %p433_p10, %s1697_s12, 1  ;;  %vm440_vm0 = vcmask 261120   ;;  %v1595_v12 = vmov 0.0   ;;  %vm1598_vm3 = vmmov 0   ;;  %v547_v31 = vld [vmem:[%s1931_s9] sm:$0xff]  ;;  %v559_v45 = vlaneseq }
  0x19   : > { %v472_v8 = vld [vmem:[%s1942_s2 + $0x38] sm:$0xff]  ;;  %v471_v9 = vld [vmem:[%s1942_s2 + $0x30] sm:$0xff]  ;;  %v470_v10 = vld [vmem:[%s1942_s2 + $0x28] sm:$0xff]  ;;  %540 = vmatprep.mubr.f32.mxu0 %v1595_v12  ;;  %1395 = vmatprep.subr.mxu1 %v1595_v12  ;;  %vm651_vm5 = vcmask 64512  }
  0x1a   : > { %s1347_s22 = sshll.u32 %s434_s21, 3  ;;  %500 = vmatprep.subr.mxu0 %v472_v8  ;;  %v469_v11 = vld [vmem:[%s1942_s2 + $0x20] sm:$0xff]  ;;  %v468_v14 = vld [vmem:[%s1942_s2 + $0x18] sm:$0xff]  ;;  %v467_v15 = vld [vmem:[%s1942_s2 + $0x10] sm:$0xff]  ;;  %s1597_s21 = smov 127   ;;  %1397 = vmatprep.mubr.msk.f32.mxu1 %vm1598_vm3, %v1595_v12  ;;  %v560_v46 = vshrl.u32 %v559_v45, 7 }
  0x1b   : > { %s436_s25 = scalar_lea.vmem %s1941_s0, %s1347_s22  ;;  %501 = vmatpush1.msra.mxu0 %v471_v9  ;;  %v466_v17 = vld [vmem:[%s1942_s2 + $0x8] sm:$0xff]  ;;  %v465_v18 = vld [vmem:[%s1942_s2] sm:$0xff]  ;;  %v562_v47 = vand.u32 127, %v559_v45 }
  0x1c   : > { %v437_v0 = vld [vmem:[%s436_s25] sm:$0xff]  ;;  %502 = vmatprep.subr.mxu0 %v470_v10 }
  0x1d   : > { %v439_v1 = vmul.f32 %v437_v0, %v437_v0  ;;  %503 = vmatpush1.msra.mxu0 %v469_v11  ;;  %v1760_v27 = vld [vmem:[%s1943_s1] sm:$0xff]  ;;  %vm563_vm4 = vcmp.le.s32.totalorder %v562_v47, %v560_v46  ;;  %v1171_v46 = vld [vmem:[%s1929_s7 + $0x18] sm:$0xff]  ;;  %v1170_v47 = vld [vmem:[%s1929_s7 + $0x10] sm:$0xff]  ;;  %s1602_s1 = smov [#allocation3]  }
  0x1e   : > { %504 = vmatprep.subr.mxu0 %v468_v14  ;;  %v549_v32 = vld [vmem:[%s1932_s10] sm:$0xff]  ;;  %v566_v14 = vld [vmem:[%s1925_s3 + $0x10] sm:$0xff]  ;;  %s1537_s2 = sshll.u32 %s1602_s1, 4  ;;  %s1538_s2 = int_to_ptr.vmem [resolvable:$false] %s1537_s2 }
  0x1f   : > { %v441_v2 = vsel %vm440_vm0, %v439_v1, 0.0  ;;  %505 = vmatpush1.msra.mxu0 %v467_v15  ;;  %v554_v33 = vld [vmem:[%s1933_s11] sm:$0xff]  ;;  %v565_v15 = vld [vmem:[%s1925_s3 + $0x8] sm:$0xff] }
  0x20   : > { %442 = vadd.xlane.f32.xlu0 %v441_v2  ;;  %506 = vmatprep.subr.mxu0 %v466_v17  ;;  %v570_v17 = vld [vmem:[%s1925_s3 + $0x30] sm:$0xff]  ;;  %v1084_v45 = vld [vmem:[%s1927_s5] sm:$0xff] }
  0x21   : > { %507 = vmatpush1.msra.mxu0 %v465_v18  ;;  %v569_v18 = vld [vmem:[%s1925_s3 + $0x28] sm:$0xff] }
  0x22   : > { %1405 = vmatprep.subr.mxu0 %v1595_v12 }
  0xa9   : > { %v443_v3 = vpop.xlane.xlu0 %442 }
  0xaa   : > { %v444_v4 = vrot.slane %v443_v3, 4 }
  0xac   : > { %v445_v5 = vadd.f32 %v444_v4, %v443_v3  ;;  %v571_v4 = vld [vmem:[%s1925_s3 + $0x38] sm:$0xff] }
  0xae   : > { %v446_v6 = vrot.slane %v445_v5, 2 }
  0xb0   : > { %v447_v7 = vadd.f32 %v446_v6, %v445_v5 }
  0xb2   : > { %v448_v13 = vrot.slane %v447_v7, 1 }
  0xb4   : > { %v449_v16 = vadd.f32 %v448_v13, %v447_v7  ;;  %v567_v13 = vld [vmem:[%s1925_s3 + $0x18] sm:$0xff] }
  0xb6   : > { %1459 = vpush %v449_v16  ;;  %v564_v16 = vld [vmem:[%s1925_s3] sm:$0xff] }
  0xe7   : > { %s1460_s24 = spop %1459 }
  0xe8   : > { %v451_v19 = vstv %s1460_s24  ;;  %s430_s24 = sand.u32 1, %s1585_s28  }
  0xe9   : > { %1513 = vrsqrt.f32 %v451_v19  ;;  %vm454_vm1 = vcmp.eq.f32.partialorder %v451_v19, inf  ;;  %v457_v22 = vand.u32 2147483648, %v451_v19  ;;  %vm456_vm2 = vcmp.eq.f32.partialorder %v451_v19, 0.0 }
  0xf6   : > { %v1514_v20 = vpop.eup %1513 }
  0xf7   : > { %v453_v21 = vmul.f32 %v1514_v20, %v451_v19 }
  0xf9   : > { %v455_v23 = vsel %vm454_vm1, %v451_v19, %v453_v21  ;;  %v568_v19 = vld [vmem:[%s1925_s3 + $0x20] sm:$0xff] }
  0xfa   : > { %v458_v24 = vsel %vm456_vm2, %v457_v22, %v455_v23 }
  0xfb   : > { %1461 = vpush %v458_v24 }
 0x12c   : > { %s1462_s25 = spop %1461 }
 0x12d   : > { %s460_s26 = smul.f32 0.0625, %s1462_s25  ;;  %s1346_s25 = sshll.u32 %s430_s24, 3 }
 0x12e   : > { %s432_s14 = scalar_lea.vmem [#allocation3], %s1346_s25 }
 0x12f   : > { %v461_v25 = vstv %s460_s26  ;;  %s1364_s26 = sshll.u32 %s1697_s12, 7  ;;  %s1539_s12 = scalar_lea.vmem %s1538_s2, 256 }
 0x130   : > { %1515 = vrcp.f32 %v461_v25 }
 0x13d   : > { %v1516_v26 = vpop.eup %1515 }
 0x13e   : > { %v463_v28 = vmul.f32 %v1516_v26, %v437_v0 }
 0x140   : > { %v1763_v29 = vmul.f32 %v463_v28, %v1760_v27 }
 0x142   : > { %1348 = vmatmul.mubr.msk.f32.vlgmr.msra.gmra.mxu0 %vm440_vm0, %v1763_v29 }
 0x143   : > { %1407 = vmatprep.mubr.msk.f32.mxu0 %vm1598_vm3, %v1595_v12 }
 0x202   : > { %v542_v30 = vpop.f32.mrf.mxu0 }
 0x203   : > { %555 = vrot.lane.b32.xlu1 %v542_v30, %s1596_s17  ;;  %550 = vrot.lane.b32.xlu0 %v542_v30, %s1597_s21  ;;  %v548_v36 = vmul.f32 %v547_v31, %v542_v30  ;;  %s1600_s17 = smov 32   ;;  %s1601_s21 = smov 96   ;;  %v1357_v31 = vld [vmem:[%s1926_s4] ss:$0 sm:$0xff] }
 0x204   : > { %v544_v42 = vpop.f32.mrf.mxu0 }
 0x275   : > { %v556_v34 = vpop.permute.xlu1 %555  ;;  %v551_v35 = vpop.permute.xlu0 %550 }
 0x276   : > { %v552_v37 = vmul.f32 %v551_v35, %v549_v32  ;;  %v557_v38 = vmul.f32 %v556_v34, %v554_v33 }
 0x278   : > { %v553_v39 = vadd.f32 %v552_v37, %v548_v36 }
 0x27a   : > { %v558_v40 = vadd.f32 %v557_v38, %v553_v39 }
 0x27c   : > { %573 = vrot.lane.b32.xlu1 %v558_v40, %s1599_s16 }
 0x280   : > { %738 = vrot.lane.b32.xlu1 %v558_v40, %s1600_s17 }
 0x284   : > { %736 = vrot.lane.b32.xlu1 %v558_v40, %s1601_s21 }
 0x2ee   : > { %v574_v41 = vpop.permute.xlu1 %573 }
 0x2ef   : > { %1396 = vmatpush3.xpose.msk.msra.mxu1 %vm440_vm0, %v574_v41  ;;  %v1087_v41 = vld [vmem:[%s1927_s5 + $0x18] sm:$0xff] }
 0x2f0   : > { %1400 = vmatprep.subr.mxu1 %v1595_v12 }
 0x2f2   : > { %1398 = vmatmul.mubr.msk.f32.vlgmr.msra.gmra.mxu1 %vm440_vm0, %v558_v40  ;;  %v739_v43 = vpop.permute.xlu1 %738 }
 0x2f3   : > { %1401 = vmatpush3.msra.mxu1 %v544_v42  ;;  %1406 = vmatpush3.xpose.msk.msra.mxu0 %vm440_vm0, %v739_v43  ;;  %v1085_v43 = vld [vmem:[%s1927_s5 + $0x8] sm:$0xff] }
 0x2f4   : > { %1402 = vmatprep.mubr.msk.f32.mxu1 %vm1598_vm3, %v1595_v12  ;;  %1410 = vmatprep.subr.mxu1 %v1595_v12 }
 0x2f5   : > { %1415 = vmatprep.subr.mxu0 %v1595_v12 }
 0x2f6   : > { %v737_v44 = vpop.permute.xlu1 %736 }
 0x2f7   : > { %1408 = vmatmul.mubr.msk.f32.vlgmr.msra.gmra.mxu0 %vm440_vm0, %v737_v44 }
 0x2f8   : > { %1423 = vmatprep.mubr.msk.f32.mxu0 %vm1598_vm3, %v1595_v12  ;;  %1416 = vmatpush3.msra.mxu0 %v571_v4 }
 0x2f9   : > { %1417 = vmatprep.subr.mxu0 %v1595_v12 }
 0x2fa   : > { %1418 = vmatpush3.msra.mxu0 %v570_v17 }
 0x2fb   : > { %1419 = vmatprep.subr.mxu0 %v1595_v12 }
 0x2fc   : > { %1420 = vmatpush3.msra.mxu0 %v569_v18 }
 0x2fd   : > { %1421 = vmatprep.subr.mxu0 %v1595_v12 }
 0x2fe   : > { %1422 = vmatpush3.msra.mxu0 %v568_v19 }
 0x2ff   : > { %1437 = vmatprep.subr.mxu0 %v1595_v12 }
 0x3b2   : > { %v645_v48 = vpop.f32.mrf.mxu1 }
 0x3b3   : > { %v649_v49 = vmul.f32 0.17677669, %v645_v48 }
 0x3b4   : > { %v1399_v50 = vpop.f32.mrf.mxu1 }
 0x3b5   : > { %v650_v51 = vsel %vm563_vm4, %v649_v49, -1e+30 }
 0x3b6   : > { %v652_v52 = vsel %vm651_vm5, %v650_v51, -inf }
 0x3b7   : > { %653 = vmax.xlane.f32.xlu1 %v652_v52  ;;  %v810_v53 = vpop.f32.mrf.mxu0 }
 0x3b8   : > { %v814_v54 = vmul.f32 0.17677669, %v810_v53 }
 0x3b9   : > { %v1409_v55 = vpop.f32.mrf.mxu0 }
 0x3ba   : > { %v815_v56 = vsel %vm563_vm4, %v814_v54, -1e+30 }
 0x3bb   : > { %v816_v57 = vsel %vm651_vm5, %v815_v56, -inf }
 0x3bc   : > { %817 = vmax.xlane.f32.xlu0 %v816_v57 }
 0x3d2   : > { %828 = vrot.lane.b32.xlu0 %v544_v42, %s1601_s21  ;;  %v1086_v42 = vld [vmem:[%s1927_s5 + $0x10] sm:$0xff] }
 0x440   : > { %v654_v58 = vpop.xlane.xlu1 %653 }
 0x441   : > { %v655_v59 = vsub.f32 %v650_v51, %v654_v58  ;;  %v1169_v58 = vld [vmem:[%s1929_s7 + $0x8] sm:$0xff] }
 0x443   : > { %v656_v60 = vmul.f32 1.442695, %v655_v59  ;;  %v1168_v59 = vld [vmem:[%s1929_s7] sm:$0xff] }
 0x445   : > { %1517 = vpow2.f32 %v656_v60  ;;  %v818_v61 = vpop.xlane.xlu0 %817  ;;  %v1358_v60 = vld [vmem:[%s1928_s6] ss:$0 sm:$0xff] }
 0x446   : > { %v819_v62 = vsub.f32 %v815_v56, %v818_v61 }
 0x448   : > { %v820_v63 = vmul.f32 1.442695, %v819_v62 }
 0x449   : > { %v829_v9 = vpop.permute.xlu0 %828 }
 0x44a   : > { %1519 = vpow2.f32 %v820_v63  ;;  %v1360_v63 = vld [vmem:[%s1930_s8] ss:$0 sm:$0xff] }
 0x452   : > { %v1518_v0 = vpop.eup %1517 }
 0x453   : > { %v658_v1 = vsel %vm651_vm5, %v1518_v0, 0.0 }
 0x454   : > { %659 = vadd.xlane.f32.xlu1 %v658_v1 }
 0x457   : > { %v1520_v2 = vpop.eup %1519 }
 0x458   : > { %v822_v3 = vsel %vm651_vm5, %v1520_v2, 0.0 }
 0x459   : > { %823 = vadd.xlane.f32.xlu1 %v822_v3 }
 0x4dd   : > { %v660_v5 = vpop.xlane.xlu1 %659 }
 0x4de   : > { %1521 = vrcp.f32 %v660_v5 }
 0x4e2   : > { %v824_v6 = vpop.xlane.xlu1 %823 }
 0x4e3   : > { %1523 = vrcp.f32 %v824_v6 }
 0x4eb   : > { %v1522_v7 = vpop.eup %1521 }
 0x4ec   : > { %v662_v8 = vmul.f32 %v1522_v7, %v1518_v0 }
 0x4ee   : > { %1403 = vmatmul.mubr.msk.f32.vlgmr.msra.gmra.mxu1 %vm651_vm5, %v662_v8 }
 0x4ef   : > { %1411 = vmatpush3.msra.mxu1 %v829_v9  ;;  %1412 = vmatprep.mubr.msk.f32.mxu1 %vm1598_vm3, %v1595_v12 }
 0x4f0   : > { %v1524_v10 = vpop.eup %1523  ;;  %1426 = vmatprep.subr.mxu1 %v1595_v12 }
 0x4f1   : > { %v826_v11 = vmul.f32 %v1524_v10, %v1520_v2  ;;  %v1253_v2 = vstv %s1252_s23  ;;  %s1270_s23 = scalar_lea.sflag [#allocation4], %s430_s24 }
 0x4f3   : > { %1413 = vmatmul.mubr.msk.f32.vlgmr.msra.gmra.mxu1 %vm651_vm5, %v826_v11 }
 0x4f4   : > { %1427 = vmatpush3.msra.mxu1 %v567_v13  ;;  %1434 = vmatprep.mubr.msk.f32.mxu1 %vm1598_vm3, %v1595_v12 }
 0x4f5   : > { %1428 = vmatprep.subr.mxu1 %v1595_v12 }
 0x4f6   : > { %1429 = vmatpush3.msra.mxu1 %v566_v14 }
 0x4f7   : > { %1430 = vmatprep.subr.mxu1 %v1595_v12 }
 0x4f8   : > { %1431 = vmatpush3.msra.mxu1 %v565_v15 }
 0x4f9   : > { %1432 = vmatprep.subr.mxu1 %v1595_v12 }
 0x4fa   : > { %1433 = vmatpush3.msra.mxu1 %v564_v16 }
 0x4fb   : > { %1448 = vmatprep.subr.mxu1 %v1595_v12 }
 0x5ae   : > { %v732_v20 = vpop.f32.mrf.mxu1 }
 0x5af   : > { %1435 = vmatmul.mubr.msk.f32.vlgmr.msra.gmra.mxu1 %vm440_vm0, %v732_v20 }
 0x5b0   : > { %v1404_v21 = vpop.f32.mrf.mxu1  ;;  %1456 = vmatprep.mubr.msk.f32.mxu1 %vm1598_vm3, %v1595_v12  ;;  %1449 = vmatpush3.msra.mxu1 %v1171_v46 }
 0x5b1   : > { %1450 = vmatprep.subr.mxu1 %v1595_v12 }
 0x5b2   : > { %1451 = vmatpush3.msra.mxu1 %v1170_v47 }
 0x5b3   : > { %v900_v22 = vpop.f32.mrf.mxu1  ;;  %1452 = vmatprep.subr.mxu1 %v1595_v12 }
 0x5b4   : > { %1424 = vmatmul.mubr.msk.f32.vlgmr.msra.gmra.mxu0 %vm440_vm0, %v900_v22  ;;  %1453 = vmatpush3.msra.mxu1 %v1169_v58 }
 0x5b5   : > { %v1414_v23 = vpop.f32.mrf.mxu1  ;;  %1445 = vmatprep.mubr.msk.f32.mxu0 %vm1598_vm3, %v1595_v12  ;;  %1438 = vmatpush3.msra.mxu0 %v1087_v41 }
 0x5b6   : > { %1439 = vmatprep.subr.mxu0 %v1595_v12  ;;  %1454 = vmatprep.subr.mxu1 %v1595_v12 }
 0x5b7   : > { %1440 = vmatpush3.msra.mxu0 %v1086_v42  ;;  %1455 = vmatpush3.msra.mxu1 %v1168_v59 }
 0x5b8   : > { %1441 = vmatprep.subr.mxu0 %v1595_v12 }
 0x5b9   : > { %1442 = vmatpush3.msra.mxu0 %v1085_v43 }
 0x5ba   : > { %1443 = vmatprep.subr.mxu0 %v1595_v12 }
 0x5bb   : > { %1444 = vmatpush3.msra.mxu0 %v1084_v45 }
 0x66f   : > { %v1046_v24 = vpop.f32.mrf.mxu1 }
 0x671   : > { %v1436_v25 = vpop.f32.mrf.mxu1 }
 0x674   : > { %v973_v26 = vpop.f32.mrf.mxu0 }
 0x675   : > { %v1047_v28 = vadd.f32 %v1046_v24, %v973_v26 }
 0x676   : > { %v1425_v30 = vpop.f32.mrf.mxu0 }
 0x677   : > { %v1050_v32 = vadd.f32 %v1047_v28, %v1763_v29 }
 0x679   : > { %v1058_v33 = vadd.f32 %v1357_v31, %v1050_v32 }
 0x67b   : > { %v1059_v34 = vmul.f32 %v1058_v33, %v1058_v33 }
 0x67d   : > { %v1060_v35 = vsel %vm440_vm0, %v1059_v34, 0.0 }
 0x67e   : > { %1061 = vadd.xlane.f32.xlu1 %v1060_v35 }
 0x707   : > { %v1062_v36 = vpop.xlane.xlu1 %1061 }
 0x708   : > { %v1063_v37 = vrot.slane %v1062_v36, 4 }
 0x70a   : > { %v1064_v38 = vadd.f32 %v1063_v37, %v1062_v36 }
 0x70c   : > { %v1065_v39 = vrot.slane %v1064_v38, 2 }
 0x70e   : > { %v1066_v40 = vadd.f32 %v1065_v39, %v1064_v38 }
 0x710   : > { %v1067_v29 = vrot.slane %v1066_v40, 1 }
 0x712   : > { %v1068_v44 = vadd.f32 %v1067_v29, %v1066_v40 }
 0x714   : > { %1463 = vpush %v1068_v44 }
 0x745   : > { %s1464_s16 = spop %1463 }
 0x746   : > { %v1070_v48 = vstv %s1464_s16  ;;  %s1283_s16 = sshll.u32 %s432_s14, 4  ;;  %s1284_s16 = int_to_ptr.vmem [resolvable:$true] %s1283_s16 }
 0x747   : > { %1525 = vrsqrt.f32 %v1070_v48  ;;  %vm1073_vm6 = vcmp.eq.f32.partialorder %v1070_v48, inf  ;;  %v1076_v51 = vand.u32 2147483648, %v1070_v48  ;;  %vm1075_vm7 = vcmp.eq.f32.partialorder %v1070_v48, 0.0  ;;  %s1533_s0 = scalar_lea.vmem %s1284_s16, 128  ;;  %p1540_p0 = scmp.lt.s32.totalorder %s1284_s16, %s1538_s2 }
 0x748   : > { %p1534_p11 = scmp.ne.s32.totalorder %s1284_s16, %s1533_s0  ;;  %p1541_p1 = scmp.lt.s32.totalorder %s1539_s12, %s1533_s0 }
 0x74a   : > { %p1535_p12 = pnand %p1534_p11, %p1714_p5  ;;  %p1542_p2 = por %p1541_p1, %p1540_p0 }
 0x74c   : > { %p1536_p13 = pneg %p1535_p12 }
 0x74e   : > { %p1543_p3 = pnand %p1542_p2, %p1536_p13 }
 0x754   : > { %v1526_v49 = vpop.eup %1525 }
 0x755   : > { %v1072_v50 = vmul.f32 %v1526_v49, %v1070_v48 }
 0x757   : > { %v1074_v52 = vsel %vm1073_vm6, %v1070_v48, %v1072_v50 }
 0x758   : > { %v1077_v53 = vsel %vm1075_vm7, %v1076_v51, %v1074_v52 }
 0x759   : > { %1465 = vpush %v1077_v53 }
 0x78a   : > { %s1466_s17 = spop %1465 }
 0x78b   : > { %s1079_s22 = smul.f32 0.0625, %s1466_s17 }
 0x78d   : > { %v1080_v54 = vstv %s1079_s22  ;;  %s1281_s22 = scalar_lea.hbm %s1935_s13, %s1364_s26 }
 0x78e   : > { %1527 = vrcp.f32 %v1080_v54 }
 0x79b   : > { %v1528_v55 = vpop.eup %1527 }
 0x79c   : > { %v1082_v56 = vmul.f32 %v1528_v55, %v1058_v33 }
 0x79e   : > { %v1083_v57 = vmul.f32 %v1082_v56, %v1760_v27 }
 0x7a0   : > { %1446 = vmatmul.mubr.msk.f32.vlgmr.msra.gmra.mxu0 %vm440_vm0, %v1083_v57 }
 0x860   : > { %v1164_v61 = vpop.f32.mrf.mxu0 }
 0x861   : > { %v1165_v27 = vadd.f32 %v1358_v60, %v1164_v61 }
 0x862   : > { %v1447_v62 = vpop.f32.mrf.mxu0 }
 0x863   : > { %1457 = vmatmul.mubr.msk.f32.vlgmr.msra.gmra.mxu1 %vm440_vm0, %v1165_v27 }
 0x923   : > { %v1248_v12 = vpop.f32.mrf.mxu1 }
 0x924   : > { %v1249_v0 = vadd.f32 %v1360_v63, %v1248_v12 }
 0x925   : > { %v1458_v1 = vpop.f32.mrf.mxu1 }
 0x926   : > { %1263 = vrot.lane.b32.xlu1 %v1249_v0, %s1601_s21  ;;  %v1254_v3 = vmul.f32 %v1253_v2, %v1249_v0 }
 0x928   : > { %v1362_v4 = vmul.f32 -1.442695, %v1254_v3 }
 0x92a   : > { %1529 = vpow2.f32 %v1362_v4 }
 0x937   : > { %v1530_v5 = vpop.eup %1529 }
 0x938   : > { %v1258_v6 = vadd.f32 1.0, %v1530_v5 }
 0x93a   : > { %1531 = vrcp.f32 %v1258_v6 }
 0x947   : > { %v1532_v7 = vpop.eup %1531 }
 0x948   : > { %v1261_v8 = vmul.f32 %v1532_v7, %v1249_v0 }
 0x998   : > { %v1264_v9 = vpop.permute.xlu1 %1263 }
 0x999   : > { %v1266_v10 = vmul.f32 %v1264_v9, %v1261_v8 }
 0x99b   : > { %v1267_v11 = vadd.f32 %v1266_v10, %v1083_v57 }
 0x99d   : > { %1268 = vst.msk [vmem:[%s432_s14] sm:$0xff] %vm440_vm0, %v1267_v11 }
 0x99e   : > { %1546 = shalt.err (!%p1543_p3)
}
 0x99f   : > { %s1547_s25 = scalar_lea.hbm %s1281_s22, 128  ;;  %s1551_s14 = scalar_lea.hbm %s1935_s13, 256 }
 0x9a0   : > { %p1548_p4 = scmp.ne.s32.totalorder %s1281_s22, %s1547_s25  ;;  %p1552_p9 = scmp.lt.s32.totalorder %s1281_s22, %s1935_s13 }
 0x9a1   : > { %p1553_p10 = scmp.lt.s32.totalorder %s1551_s14, %s1547_s25 }
 0x9a2   : > { %p1549_p7 = pnand %p1548_p4, %p1714_p5 }
 0x9a3   : > { %p1554_p11 = por %p1553_p10, %p1552_p9 }
 0x9a4   : > { %p1550_p8 = pneg %p1549_p7 }
 0x9a6   : > { %p1555_p12 = pnand %p1554_p11, %p1550_p8 }
 0x9a8   : > { %1558 = shalt.err (!%p1555_p12)
}
 0x9a9   : > { %1467 = dma.vmem_to_hbm [thread:$0]  (%p1714_p5), %s1284_s16, 128, %s1281_s22, %s1270_s23  }
 0x9aa PF: > { %p1473_p13 = scmp.ge.s32.totalorder %s1593_s30, 2  ;;  %s1295_s0 = sand.u32 1, %s1581_s27  }
 0x9ab   : > { %s1296_s1 = scalar_lea.sflag [#allocation4], %s1295_s0 }
 0x9ac   : > { %p1470_p0 = pnand %p1473_p13, %p1718_p6 }
 0x9ae   : > { %p1471_p1 = pneg %p1470_p0 }
 0x9b0   : > { %1576 = dma.done.wait (%p1471_p1), %s1296_s1, 128  }
 0x9b1   : > { %1578 = vsyncadd (%p1471_p1), %s1296_s1, 4294967168  ;;  %p24_p2 = scmp.ge.s32.totalorder %s1701_s15, 4   ;;  %s1944_s27 = smov %s1585_s28 }
 0x9b2   : > { %s1945_s28 = smov %s1589_s29  ;;  %s1946_s29 = smov %s1712_s18 }
 0x9b3   : > { %s1947_s30 = smov %s1701_s15  ;;  %26 = sbr.rel (!%p24_p2) target bundleno = 8 (0x8), region = 107 }
 0x9b8   :  { %1301 = vsyncpa [#allocation4], 1 }
 0x9b9   :  { %1303 = vsyncpa [#allocation4 + $0x1], 1 }

</bundles_post_ra>
